<compile_context>
chip_gen: v7x
topology: tpu7x:2x2x1
jax: 0.10.0
libtpu: 0.0.40
codegen_flags: <defaults>
</compile_context>

<pallas_src>
import functools

import jax
import jax.numpy as jnp
from jax.experimental import pallas as pl
from jax.experimental.pallas import tpu as pltpu


def _gru_cell_kernel(x_ref, w_ref, b_ref, out_ref, *, beta, threshold):
    """One (hidden-block, batch-row) cell of the GRUCell forward.

    x_ref:   (1, I, T)   input in its original (batch, input_size, num_steps) layout
    w_ref:   (3, TH, I)  linear_ih.weight viewed as (3 gates, hidden, input), H-block j
    b_ref:   (TH, 4)     columns: [b_r (ih+hh), b_z (ih+hh), b_n_ih, b_n_hh]
    out_ref: (1, TH, T)  spikes, already in the final (batch, hidden, num_steps) layout
    """
    th = out_ref.shape[1]
    num_steps = out_ref.shape[2]

    x_it = x_ref[0]            # (I, T): keep num_steps on lanes end-to-end (no relayout)
    b = b_ref[...]             # (TH, 4)

    # linear_ih, computed straight in output orientation (hidden on sublanes, time on
    # lanes):  y_g[h, t] = sum_i W_ih_g[h, i] * x[i, t] + bias_g[h].
    # h == 0 in the reference forward, so linear_hh contributes only its bias, which the
    # wrapper has already folded into b_ref (r/z gates fully folded; n-gate b_hh kept
    # separate because it is gated by r).
    y_r = jnp.dot(w_ref[0], x_it, preferred_element_type=jnp.float32) + b[:, 0:1]
    y_z = jnp.dot(w_ref[1], x_it, preferred_element_type=jnp.float32) + b[:, 1:2]
    y_n = jnp.dot(w_ref[2], x_it, preferred_element_type=jnp.float32) + b[:, 2:3]

    # spikingjelly ATan() forward pass == heaviside(x) == (x >= 0); the atan shape only
    # affects the backward pass.
    r = (y_r >= 0.0).astype(jnp.float32)
    z = (y_z >= 0.0).astype(jnp.float32)
    n = ((y_n + r * b[:, 3:4]) >= 0.0).astype(jnp.float32)
    cur = (1.0 - z) * n                              # (TH, T);  (1-z)*n + z*h with h == 0

    # snn.Leaky(beta, init_hidden=True), reset-by-subtraction, zero initial membrane:
    #   reset_t = (mem_t > thr);  mem_{t+1} = beta*mem_t + cur_t - reset_t*thr
    #   spk_t   = (mem_{t+1} > thr)        (snntorch atan forward: strict >)
    step_id = jax.lax.broadcasted_iota(jnp.int32, (th, num_steps), 1)
    mem = jnp.zeros((th, 1), jnp.float32)
    spk = jnp.zeros((th, num_steps), jnp.float32)
    for t in range(num_steps):  # static & tiny (num_steps defaults to 4) -> unrolled
        reset = (mem > threshold).astype(jnp.float32)
        mem = beta * mem + cur[:, t:t + 1] - reset * threshold
        # Masked lane-insert instead of a lane-dim concatenate: no extra buffers.
        spk = jnp.where(step_id == t, (mem > threshold).astype(jnp.float32), spk)

    out_ref[0] = spk                                 # final (B, H, num_steps) layout


def _pick_h_block(hidden_size: int) -> int:
    """Largest lane/sublane-friendly hidden block: whole H unless H is 128-divisible."""
    if hidden_size % 128 == 0:
        for cand in (512, 256, 128):
            if hidden_size % cand == 0:
                return min(cand, hidden_size)
    return hidden_size


def gru_cell_forward(x, w_ih, b_ih, w_hh, b_hh, *, num_steps=4, beta=0.99,
                     threshold=1.0):
    """GRUCell.forward, temporal branch.

    x:    (B, input_size, num_steps) float32
    w_ih: (3*hidden, input_size),  b_ih: (3*hidden,)
    w_hh: (3*hidden, hidden),      b_hh: (3*hidden,)
    Returns stacked spikes, shape (B, hidden, num_steps), float32 in {0, 1}.

    w_hh is accepted for interface fidelity but is mathematically unused in this forward
    pass (h is initialized to zeros inside forward, so linear_hh contributes only b_hh).
    """
    # TODO(synk): static input branch (x of shape (B, input_size)) and output_mems=True
    # (membrane recording / full_rec) are not implemented here.
    del w_hh

    B, I, T = x.shape
    if T != num_steps:
        raise ValueError(f"expected trailing dim == num_steps ({num_steps}), got {T}")
    H = w_ih.shape[0] // 3
    th = _pick_h_block(H)
    n_h = H // th

    x = x.astype(jnp.float32)
    # (3H, I) -> (3, H, I): pure reshape (no data movement); the torch.split of the gates
    # becomes leading-dim indexing inside the kernel.
    w_gates = w_ih.astype(jnp.float32).reshape(3, H, I)
    b_ih = b_ih.astype(jnp.float32)
    b_hh = b_hh.astype(jnp.float32)
    # Fold the constant linear_hh(0) bias contribution into the gate biases once, outside
    # the hot path.
    bias_cols = jnp.stack(
        [b_ih[0:H] + b_hh[0:H],          # r gate (fully folded)
         b_ih[H:2 * H] + b_hh[H:2 * H],  # z gate (fully folded)
         b_ih[2 * H:3 * H],              # n gate, input-path bias
         b_hh[2 * H:3 * H]],             # n gate, hidden-path bias (gated by r)
        axis=1)                          # (H, 4)

    kernel = functools.partial(_gru_cell_kernel, beta=float(beta),
                               threshold=float(threshold))

    # TODO(synk): spikes could be emitted as bf16/int8 to halve/quarter output HBM bytes;
    # kept float32 to mirror the PyTorch module's output dtype.
    return pl.pallas_call(
        kernel,
        out_shape=jax.ShapeDtypeStruct((B, H, T), jnp.float32),
        grid_spec=pltpu.PrefetchScalarGridSpec(
            num_scalar_prefetch=0,
            # H-blocks outer, batch inner: the (largest) weight/bias blocks keep the same
            # block index across the inner batch sweep (DMA'd once per H-block) while the
            # small per-row x / out tiles are double-buffered and pipelined.
            grid=(n_h, B),
            in_specs=[
                pl.BlockSpec((1, I, T), lambda j, b: (b, 0, 0)),    # x       (B, I, T)
                pl.BlockSpec((3, th, I), lambda j, b: (0, j, 0)),   # weights (3, H, I)
                pl.BlockSpec((th, 4), lambda j, b: (j, 0)),         # biases  (H, 4)
            ],
            out_specs=pl.BlockSpec((1, th, T), lambda j, b: (b, j, 0)),
        ),
        compiler_params=pltpu.CompilerParams(
            # Every grid cell writes a disjoint output block -> both axes parallel
            # (lets v7x shard the grid across its 2 TensorCores; no-op on v5e/v6e).
            dimension_semantics=("parallel", "parallel"),
            vmem_limit_bytes=32 * 1024 * 1024,  # safe on v5e/v6e/v7x; tiles are tiny
        ),
    )(x, w_gates, bias_cols)


def _reference(x, w_ih, b_ih, w_hh, b_hh, *, num_steps, beta=0.99, threshold=1.0):
    """Pure-JAX reference mirroring the PyTorch forward (temporal branch) step by step."""
    B, I, T = x.shape
    H = w_hh.shape[0] // 3
    xt = jnp.swapaxes(x, -1, -2)                                    # (B, T, I)
    h = jnp.zeros((B, H, T), jnp.float32)
    y_ih = jnp.swapaxes(xt @ w_ih.T + b_ih, -1, -2)                 # (B, 3H, T)
    y_hh = jnp.swapaxes(jnp.swapaxes(h, -1, -2) @ w_hh.T + b_hh, -1, -2)
    heav = lambda v: (v >= 0).astype(jnp.float32)                   # spikingjelly ATan fwd
    r = heav(y_ih[:, 0:H] + y_hh[:, 0:H])
    z = heav(y_ih[:, H:2 * H] + y_hh[:, H:2 * H])
    n = heav(y_ih[:, 2 * H:] + r * y_hh[:, 2 * H:])
    cur = (1.0 - z) * n + z * h
    mem = jnp.zeros((B, H), jnp.float32)
    spk_rec = []
    for t in range(num_steps):                                      # snn.Leaky, subtract reset
        reset = (mem > threshold).astype(jnp.float32)
        mem = beta * mem + cur[:, :, t] - reset * threshold
        spk_rec.append((mem > threshold).astype(jnp.float32))
    return jnp.stack(spk_rec, axis=-1)                              # (B, H, num_steps)


if __name__ == "__main__":
    key = jax.random.PRNGKey(0)
    kx, k_wih, k_bih, k_whh, k_bhh = jax.random.split(key, 5)

    batch, input_size, hidden_size, num_steps = 2, 16, 32, 4

    # Quantize inputs / parameters onto a coarse dyadic grid so every gate pre-activation
    # is computed exactly (bf16-exact operands, exact f32 partial sums) by both the MXU
    # kernel and the XLA reference.  The heaviside/threshold comparisons of this binary
    # spiking network are then deterministic and the equality check cannot flake on
    # threshold-boundary rounding (a correctness concern raised in review).
    def q(v, denom):
        return jnp.round(v * denom) / denom

    x = q(jax.random.normal(kx, (batch, input_size, num_steps), jnp.float32), 4.0)
    bound_ih = 1.0 / (input_size ** 0.5)   # nn.Linear default init bounds
    bound_hh = 1.0 / (hidden_size ** 0.5)
    w_ih = q(jax.random.uniform(k_wih, (3 * hidden_size, input_size), jnp.float32,
                                -bound_ih, bound_ih), 64.0)
    b_ih = q(jax.random.uniform(k_bih, (3 * hidden_size,), jnp.float32,
                                -bound_ih, bound_ih), 64.0)
    w_hh = q(jax.random.uniform(k_whh, (3 * hidden_size, hidden_size), jnp.float32,
                                -bound_hh, bound_hh), 64.0)
    b_hh = q(jax.random.uniform(k_bhh, (3 * hidden_size,), jnp.float32,
                                -bound_hh, bound_hh), 64.0)

    out = jax.block_until_ready(
        gru_cell_forward(x, w_ih, b_ih, w_hh, b_hh, num_steps=num_steps))
    ref = jax.block_until_ready(
        _reference(x, w_ih, b_ih, w_hh, b_hh, num_steps=num_steps))

    assert out.shape == (batch, hidden_size, num_steps), out.shape
    assert bool(jnp.array_equal(out, ref)), "Pallas kernel mismatch vs pure-JAX reference"
    print("KERNEL_OK")
</pallas_src>

<mosaic_0001>
module attributes {stable_mosaic.version = 11 : i64} {
  func.func @_gru_cell_kernel(%arg0: i32, %arg1: i32, %arg2: memref<1x16x4xf32, #tpu.memory_space<vmem>>, %arg3: memref<3x32x16xf32, #tpu.memory_space<vmem>>, %arg4: memref<32x4xf32, #tpu.memory_space<vmem>>, %arg5: memref<1x32x4xf32, #tpu.memory_space<vmem>>) attributes {dimension_semantics = [#tpu.dimension_semantics<parallel>, #tpu.dimension_semantics<parallel>], iteration_bounds = array<i64: 1, 2>, scalar_prefetch = 0 : i64, scratch_operands = 0 : i64, tpu.core_type = #tpu.core_type<tc>, window_params = [{transform_indices = @transform_0, window_bounds = array<i64: 1, 16, 4>}, {transform_indices = @transform_1, window_bounds = array<i64: 3, 32, 16>}, {transform_indices = @transform_2, window_bounds = array<i64: 32, 4>}, {transform_indices = @transform_3, window_bounds = array<i64: 1, 32, 4>}]} {
    %c0 = arith.constant 0 : index
    %c0_0 = arith.constant 0 : index
    %c0_1 = arith.constant 0 : index
    %0 = vector.load %arg2[%c0, %c0_0, %c0_1] : memref<1x16x4xf32, #tpu.memory_space<vmem>>, vector<1x16x4xf32>
    %1 = vector.shape_cast %0 : vector<1x16x4xf32> to vector<16x4xf32>
    %c0_2 = arith.constant 0 : index
    %c0_3 = arith.constant 0 : index
    %2 = vector.load %arg4[%c0_2, %c0_3] : memref<32x4xf32, #tpu.memory_space<vmem>>, vector<32x4xf32>
    %c0_4 = arith.constant 0 : index
    %c0_5 = arith.constant 0 : index
    %c0_6 = arith.constant 0 : index
    %3 = vector.load %arg3[%c0_4, %c0_5, %c0_6] : memref<3x32x16xf32, #tpu.memory_space<vmem>>, vector<1x32x16xf32>
    %4 = vector.shape_cast %3 : vector<1x32x16xf32> to vector<32x16xf32>
    %cst = arith.constant dense<0.000000e+00> : vector<32x4xf32>
    %5 = tpu.matmul %4, %1, %cst {dimension_numbers = #tpu.dot_dimension_numbers<[1], [0], [0], [1], [0, 0, 1, 1], [], []>} : vector<32x16xf32>, vector<16x4xf32>, vector<32x4xf32> -> vector<32x4xf32>
    %6 = vector.extract_strided_slice %2 {offsets = [0, 0], sizes = [32, 1], strides = [1, 1]} : vector<32x4xf32> to vector<32x1xf32>
    %7 = vector.broadcast %6 : vector<32x1xf32> to vector<32x4xf32>
    %8 = arith.addf %5, %7 : vector<32x4xf32>
    %c1 = arith.constant 1 : index
    %c0_7 = arith.constant 0 : index
    %c0_8 = arith.constant 0 : index
    %9 = vector.load %arg3[%c1, %c0_7, %c0_8] : memref<3x32x16xf32, #tpu.memory_space<vmem>>, vector<1x32x16xf32>
    %10 = vector.shape_cast %9 : vector<1x32x16xf32> to vector<32x16xf32>
    %cst_9 = arith.constant dense<0.000000e+00> : vector<32x4xf32>
    %11 = tpu.matmul %10, %1, %cst_9 {dimension_numbers = #tpu.dot_dimension_numbers<[1], [0], [0], [1], [0, 0, 1, 1], [], []>} : vector<32x16xf32>, vector<16x4xf32>, vector<32x4xf32> -> vector<32x4xf32>
    %12 = vector.extract_strided_slice %2 {offsets = [0, 1], sizes = [32, 1], strides = [1, 1]} : vector<32x4xf32> to vector<32x1xf32>
    %13 = vector.broadcast %12 : vector<32x1xf32> to vector<32x4xf32>
    %14 = arith.addf %11, %13 : vector<32x4xf32>
    %c2 = arith.constant 2 : index
    %c0_10 = arith.constant 0 : index
    %c0_11 = arith.constant 0 : index
    %15 = vector.load %arg3[%c2, %c0_10, %c0_11] : memref<3x32x16xf32, #tpu.memory_space<vmem>>, vector<1x32x16xf32>
    %16 = vector.shape_cast %15 : vector<1x32x16xf32> to vector<32x16xf32>
    %cst_12 = arith.constant dense<0.000000e+00> : vector<32x4xf32>
    %17 = tpu.matmul %16, %1, %cst_12 {dimension_numbers = #tpu.dot_dimension_numbers<[1], [0], [0], [1], [0, 0, 1, 1], [], []>} : vector<32x16xf32>, vector<16x4xf32>, vector<32x4xf32> -> vector<32x4xf32>
    %18 = vector.extract_strided_slice %2 {offsets = [0, 2], sizes = [32, 1], strides = [1, 1]} : vector<32x4xf32> to vector<32x1xf32>
    %19 = vector.broadcast %18 : vector<32x1xf32> to vector<32x4xf32>
    %20 = arith.addf %17, %19 : vector<32x4xf32>
    %cst_13 = arith.constant 0.000000e+00 : f32
    %21 = vector.broadcast %cst_13 : f32 to vector<32x4xf32>
    %22 = arith.cmpf oge, %8, %21 : vector<32x4xf32>
    %23 = arith.extui %22 : vector<32x4xi1> to vector<32x4xi32>
    %24 = arith.sitofp %23 : vector<32x4xi32> to vector<32x4xf32>
    %cst_14 = arith.constant 0.000000e+00 : f32
    %25 = vector.broadcast %cst_14 : f32 to vector<32x4xf32>
    %26 = arith.cmpf oge, %14, %25 : vector<32x4xf32>
    %27 = arith.extui %26 : vector<32x4xi1> to vector<32x4xi32>
    %28 = arith.sitofp %27 : vector<32x4xi32> to vector<32x4xf32>
    %29 = vector.extract_strided_slice %2 {offsets = [0, 3], sizes = [32, 1], strides = [1, 1]} : vector<32x4xf32> to vector<32x1xf32>
    %30 = vector.broadcast %29 : vector<32x1xf32> to vector<32x4xf32>
    %31 = arith.mulf %24, %30 : vector<32x4xf32>
    %32 = arith.addf %20, %31 : vector<32x4xf32>
    %cst_15 = arith.constant 0.000000e+00 : f32
    %33 = vector.broadcast %cst_15 : f32 to vector<32x4xf32>
    %34 = arith.cmpf oge, %32, %33 : vector<32x4xf32>
    %35 = arith.extui %34 : vector<32x4xi1> to vector<32x4xi32>
    %36 = arith.sitofp %35 : vector<32x4xi32> to vector<32x4xf32>
    %cst_16 = arith.constant 1.000000e+00 : f32
    %37 = vector.broadcast %cst_16 : f32 to vector<32x4xf32>
    %38 = arith.subf %37, %28 : vector<32x4xf32>
    %39 = arith.mulf %38, %36 : vector<32x4xf32>
    %40 = tpu.iota {dimensions = array<i32: 1>} : vector<32x4xi32>
    %cst_17 = arith.constant 0.000000e+00 : f32
    %41 = vector.broadcast %cst_17 : f32 to vector<32x1xf32>
    %cst_18 = arith.constant 0.000000e+00 : f32
    %42 = vector.broadcast %cst_18 : f32 to vector<32x4xf32>
    %cst_19 = arith.constant 1.000000e+00 : f32
    %43 = vector.broadcast %cst_19 : f32 to vector<32x1xf32>
    %44 = arith.cmpf ogt, %41, %43 : vector<32x1xf32>
    %45 = arith.extui %44 : vector<32x1xi1> to vector<32x1xi32>
    %46 = arith.sitofp %45 : vector<32x1xi32> to vector<32x1xf32>
    %cst_20 = arith.constant 9.900000e-01 : f32
    %47 = vector.broadcast %cst_20 : f32 to vector<32x1xf32>
    %48 = arith.mulf %47, %41 : vector<32x1xf32>
    %49 = vector.extract_strided_slice %39 {offsets = [0, 0], sizes = [32, 1], strides = [1, 1]} : vector<32x4xf32> to vector<32x1xf32>
    %50 = arith.addf %48, %49 : vector<32x1xf32>
    %cst_21 = arith.constant 1.000000e+00 : f32
    %51 = vector.broadcast %cst_21 : f32 to vector<32x1xf32>
    %52 = arith.mulf %46, %51 : vector<32x1xf32>
    %53 = arith.subf %50, %52 : vector<32x1xf32>
    %c0_i32 = arith.constant 0 : i32
    %54 = vector.broadcast %c0_i32 : i32 to vector<32x4xi32>
    %55 = arith.cmpi eq, %40, %54 : vector<32x4xi32>
    %cst_22 = arith.constant 1.000000e+00 : f32
    %56 = vector.broadcast %cst_22 : f32 to vector<32x1xf32>
    %57 = arith.cmpf ogt, %53, %56 : vector<32x1xf32>
    %58 = arith.extui %57 : vector<32x1xi1> to vector<32x1xi32>
    %59 = arith.sitofp %58 : vector<32x1xi32> to vector<32x1xf32>
    %60 = vector.shape_cast %59 : vector<32x1xf32> to vector<32x1xf32>
    %61 = vector.broadcast %60 : vector<32x1xf32> to vector<32x4xf32>
    %62 = arith.select %55, %61, %42 : vector<32x4xi1>, vector<32x4xf32>
    %cst_23 = arith.constant 1.000000e+00 : f32
    %63 = vector.broadcast %cst_23 : f32 to vector<32x1xf32>
    %64 = arith.cmpf ogt, %53, %63 : vector<32x1xf32>
    %65 = arith.extui %64 : vector<32x1xi1> to vector<32x1xi32>
    %66 = arith.sitofp %65 : vector<32x1xi32> to vector<32x1xf32>
    %cst_24 = arith.constant 9.900000e-01 : f32
    %67 = vector.broadcast %cst_24 : f32 to vector<32x1xf32>
    %68 = arith.mulf %67, %53 : vector<32x1xf32>
    %69 = vector.extract_strided_slice %39 {offsets = [0, 1], sizes = [32, 1], strides = [1, 1]} : vector<32x4xf32> to vector<32x1xf32>
    %70 = arith.addf %68, %69 : vector<32x1xf32>
    %cst_25 = arith.constant 1.000000e+00 : f32
    %71 = vector.broadcast %cst_25 : f32 to vector<32x1xf32>
    %72 = arith.mulf %66, %71 : vector<32x1xf32>
    %73 = arith.subf %70, %72 : vector<32x1xf32>
    %c1_i32 = arith.constant 1 : i32
    %74 = vector.broadcast %c1_i32 : i32 to vector<32x4xi32>
    %75 = arith.cmpi eq, %40, %74 : vector<32x4xi32>
    %cst_26 = arith.constant 1.000000e+00 : f32
    %76 = vector.broadcast %cst_26 : f32 to vector<32x1xf32>
    %77 = arith.cmpf ogt, %73, %76 : vector<32x1xf32>
    %78 = arith.extui %77 : vector<32x1xi1> to vector<32x1xi32>
    %79 = arith.sitofp %78 : vector<32x1xi32> to vector<32x1xf32>
    %80 = vector.shape_cast %79 : vector<32x1xf32> to vector<32x1xf32>
    %81 = vector.broadcast %80 : vector<32x1xf32> to vector<32x4xf32>
    %82 = arith.select %75, %81, %62 : vector<32x4xi1>, vector<32x4xf32>
    %cst_27 = arith.constant 1.000000e+00 : f32
    %83 = vector.broadcast %cst_27 : f32 to vector<32x1xf32>
    %84 = arith.cmpf ogt, %73, %83 : vector<32x1xf32>
    %85 = arith.extui %84 : vector<32x1xi1> to vector<32x1xi32>
    %86 = arith.sitofp %85 : vector<32x1xi32> to vector<32x1xf32>
    %cst_28 = arith.constant 9.900000e-01 : f32
    %87 = vector.broadcast %cst_28 : f32 to vector<32x1xf32>
    %88 = arith.mulf %87, %73 : vector<32x1xf32>
    %89 = vector.extract_strided_slice %39 {offsets = [0, 2], sizes = [32, 1], strides = [1, 1]} : vector<32x4xf32> to vector<32x1xf32>
    %90 = arith.addf %88, %89 : vector<32x1xf32>
    %cst_29 = arith.constant 1.000000e+00 : f32
    %91 = vector.broadcast %cst_29 : f32 to vector<32x1xf32>
    %92 = arith.mulf %86, %91 : vector<32x1xf32>
    %93 = arith.subf %90, %92 : vector<32x1xf32>
    %c2_i32 = arith.constant 2 : i32
    %94 = vector.broadcast %c2_i32 : i32 to vector<32x4xi32>
    %95 = arith.cmpi eq, %40, %94 : vector<32x4xi32>
    %cst_30 = arith.constant 1.000000e+00 : f32
    %96 = vector.broadcast %cst_30 : f32 to vector<32x1xf32>
    %97 = arith.cmpf ogt, %93, %96 : vector<32x1xf32>
    %98 = arith.extui %97 : vector<32x1xi1> to vector<32x1xi32>
    %99 = arith.sitofp %98 : vector<32x1xi32> to vector<32x1xf32>
    %100 = vector.shape_cast %99 : vector<32x1xf32> to vector<32x1xf32>
    %101 = vector.broadcast %100 : vector<32x1xf32> to vector<32x4xf32>
    %102 = arith.select %95, %101, %82 : vector<32x4xi1>, vector<32x4xf32>
    %cst_31 = arith.constant 1.000000e+00 : f32
    %103 = vector.broadcast %cst_31 : f32 to vector<32x1xf32>
    %104 = arith.cmpf ogt, %93, %103 : vector<32x1xf32>
    %105 = arith.extui %104 : vector<32x1xi1> to vector<32x1xi32>
    %106 = arith.sitofp %105 : vector<32x1xi32> to vector<32x1xf32>
    %cst_32 = arith.constant 9.900000e-01 : f32
    %107 = vector.broadcast %cst_32 : f32 to vector<32x1xf32>
    %108 = arith.mulf %107, %93 : vector<32x1xf32>
    %109 = vector.extract_strided_slice %39 {offsets = [0, 3], sizes = [32, 1], strides = [1, 1]} : vector<32x4xf32> to vector<32x1xf32>
    %110 = arith.addf %108, %109 : vector<32x1xf32>
    %cst_33 = arith.constant 1.000000e+00 : f32
    %111 = vector.broadcast %cst_33 : f32 to vector<32x1xf32>
    %112 = arith.mulf %106, %111 : vector<32x1xf32>
    %113 = arith.subf %110, %112 : vector<32x1xf32>
    %c3_i32 = arith.constant 3 : i32
    %114 = vector.broadcast %c3_i32 : i32 to vector<32x4xi32>
    %115 = arith.cmpi eq, %40, %114 : vector<32x4xi32>
    %cst_34 = arith.constant 1.000000e+00 : f32
    %116 = vector.broadcast %cst_34 : f32 to vector<32x1xf32>
    %117 = arith.cmpf ogt, %113, %116 : vector<32x1xf32>
    %118 = arith.extui %117 : vector<32x1xi1> to vector<32x1xi32>
    %119 = arith.sitofp %118 : vector<32x1xi32> to vector<32x1xf32>
    %120 = vector.shape_cast %119 : vector<32x1xf32> to vector<32x1xf32>
    %121 = vector.broadcast %120 : vector<32x1xf32> to vector<32x4xf32>
    %122 = arith.select %115, %121, %102 : vector<32x4xi1>, vector<32x4xf32>
    %c0_35 = arith.constant 0 : index
    %c0_36 = arith.constant 0 : index
    %c0_37 = arith.constant 0 : index
    %123 = vector.load %arg5[%c0_35, %c0_36, %c0_37] : memref<1x32x4xf32, #tpu.memory_space<vmem>>, vector<1x32x4xf32>
    %124 = vector.shape_cast %123 : vector<1x32x4xf32> to vector<32x4xf32>
    %125 = vector.shape_cast %122 : vector<32x4xf32> to vector<1x32x4xf32>
    tpu.vector_store %arg5[%c0_35, %c0_36, %c0_37], %125 {strides = array<i32>} : memref<1x32x4xf32, #tpu.memory_space<vmem>>, vector<1x32x4xf32>,
    return
  }
  func.func @transform_0(%arg0: i32, %arg1: i32) -> (i32, i32, i32) {
    %c0_i32 = arith.constant 0 : i32
    %c0_i32_0 = arith.constant 0 : i32
    %c0_i32_1 = arith.constant 0 : i32
    return %arg1, %c0_i32, %c0_i32_0 : i32, i32, i32
  }
  func.func @transform_1(%arg0: i32, %arg1: i32) -> (i32, i32, i32) {
    %c0_i32 = arith.constant 0 : i32
    %c0_i32_0 = arith.constant 0 : i32
    %c0_i32_1 = arith.constant 0 : i32
    return %c0_i32, %arg0, %c0_i32_0 : i32, i32, i32
  }
  func.func @transform_2(%arg0: i32, %arg1: i32) -> (i32, i32) {
    %c0_i32 = arith.constant 0 : i32
    %c0_i32_0 = arith.constant 0 : i32
    return %arg0, %c0_i32 : i32, i32
  }
  func.func @transform_3(%arg0: i32, %arg1: i32) -> (i32, i32, i32) {
    %c0_i32 = arith.constant 0 : i32
    %c0_i32_0 = arith.constant 0 : i32
    return %arg1, %arg0, %c0_i32 : i32, i32, i32
  }
}

</mosaic_0001>

<bundles_post_ra>
// kernel: tpu_custom_call.1
= control target key start
LH: loop header
LB: loop body
LE: loop exit
PB: predicated region body
PF: predicated region fallthrough
CT: control target
= control target key end

     0   :  { %s1282_s12 = smov 0   ;;  %s1284_s13 = smov 0   ;;  %s1431_s0 = inlined_call_operand.vmem [shape: f32[2,16,4], index: 0, kind: input, shape index: {}]   ;;  %s1432_s1 = inlined_call_operand.vmem [shape: f32[3,32,16], index: 1, kind: input, shape index: {}]   ;;  %s1433_s2 = inlined_call_operand.vmem [shape: f32[32,4], index: 2, kind: input, shape index: {}]   ;;  %s1434_s3 = inlined_call_operand.vmem [shape: f32[2,32,4], index: 3, kind: output, shape index: {}]  }
   0x1   :  { %s1286_s14 = smov 0  }
   0x2 LB: > { %s22_s15 = sadd.s32 1, %s1248_s13  ;;  %p1029_p0 = scmp.ge.s32.totalorder %s1252_s14, 1  ;;  %s1252_s14 = sphi %s1286_s14, %s13_s14   ;;  %s1248_s13 = sphi %s1284_s13, %s1436_s13   ;;  %s1244_s12 = sphi %s1282_s12, %s1435_s12  }
   0x3   : > { %p23_p1 = scmp.ge.s32.totalorder %s22_s15, 2  ;;  %p173_p2 = scmp.lt.s32.totalorder %s1252_s14, 3 }
   0x5   : > { %s1438_s15 = smov (%p23_p1, %s22_s15), 0  ;;  %p174_p3 = pnand %p1029_p0, %p173_p2 }
   0x6   : > { %p211_p4 = scmp.lt.s32.totalorder (!%p174_p3), %s1244_s12, 1  ;;  %v244_v0 = vld [vmem:[%s1432_s1] sm:$0xff] (!%p174_p3)  ;;  %vm268_vm0 = vcmask (!%p174_p3), 130048   ;;  %v246_v1 = vld [vmem:[%s1432_s1 + $0x10] sm:$0xff] (!%p174_p3)  ;;  %v1254_v2 = vmov (!%p174_p3), 0   ;;  %v243_v8 = vld [vmem:[%s1433_s2 + $0x18] sm:$0xff] (!%p174_p3) }
   0x7   : > { %177 = sbr.rel (%p174_p3) target bundleno = 525 (0x20d), region = 32  ;;  %1108 = vmatprep.mubr.msk.f32.mxu0 (!%p174_p3), %vm268_vm0, %v244_v0  ;;  %1111 = vmatprep.mubr.msk.f32.mxu1 (!%p174_p3), %vm268_vm0, %v246_v1  ;;  %v242_v3 = vld [vmem:[%s1433_s2 + $0x10] sm:$0xff] (!%p174_p3)  ;;  %v240_v4 = vld [vmem:[%s1433_s2] sm:$0xff] (!%p174_p3)  ;;  %v245_v9 = vld [vmem:[%s1432_s1 + $0x8] sm:$0xff] (!%p174_p3)  ;;  %v1255_v18 = vmov (!%p174_p3), 1   ;;  %v1256_v21 = vmov (!%p174_p3), 2  }
   0x8   : > { %1181 = vset.pattern.permute.xlu1 (!%p174_p3), %v1254_v2  ;;  %1180 = vset.pattern.permute.xlu0 (!%p174_p3), %v1254_v2  ;;  %v247_v10 = vld [vmem:[%s1432_s1 + $0x18] sm:$0xff] (!%p174_p3)  ;;  %v241_v11 = vld [vmem:[%s1433_s2 + $0x8] sm:$0xff] (!%p174_p3)  ;;  %v1038_v12 = vld [vmem:[%s1432_s1 + $0x20] sm:$0xff] (!%p174_p3)  ;;  %v1257_v22 = vmov (!%p174_p3), 3   ;;  %v1258_v47 = vmov (!%p174_p3), 0.0   ;;  %s1259_s29 = smov (!%p174_p3), 127  }
   0x9   : > { %260 = vperm.xlu1 (!%p174_p3), %1181, %v242_v3   ;;  %250 = vperm.xlu0 (!%p174_p3), %1180, %v240_v4   ;;  %v1046_v13 = vld [vmem:[%s1432_s1 + $0x40] sm:$0xff] (!%p174_p3)  ;;  %v1039_v14 = vld [vmem:[%s1432_s1 + $0x28] sm:$0xff] (!%p174_p3)  ;;  %v1040_v16 = vld [vmem:[%s1432_s1 + $0x30] sm:$0xff] (!%p174_p3)  ;;  %s1260_s30 = smov (!%p174_p3), 126   ;;  %s1261_s4 = smov (!%p174_p3), 125  }
   0xa   : > { %v1047_v15 = vld [vmem:[%s1432_s1 + $0x48] sm:$0xff] (!%p174_p3)  ;;  %v1048_v17 = vld [vmem:[%s1432_s1 + $0x50] sm:$0xff] (!%p174_p3)  ;;  %v1041_v19 = vld [vmem:[%s1432_s1 + $0x38] sm:$0xff] (!%p174_p3) }
   0xb   : > { %v1049_v20 = vld [vmem:[%s1432_s1 + $0x58] sm:$0xff] (!%p174_p3) }
   0xd   : > { %265 = vperm.xlu1 (!%p174_p3), %1181, %v243_v8   ;;  %255 = vperm.xlu0 (!%p174_p3), %1180, %v241_v11  }
   0xe   : > { %s1440_s12 = smov (!%p211_p4, %s1244_s12), 1 }
   0xf   : > { %s1084_s20 = sshll.u32 %s1440_s12, 4  ;;  %s1085_s5 = sshll.u32 %s1440_s12, 5 }
  0x10   : > { %s215_s25 = scalar_lea.vmem %s1431_s0, %s1084_s20  ;;  %s236_s12 = scalar_lea.vmem %s1434_s3, %s1085_s5 }
  0x11   : > { %v238_v5 = vld [vmem:[%s215_s25] sm:$0xff]  ;;  %v239_v6 = vld [vmem:[%s215_s25 + $0x8] sm:$0xff]  ;;  %1183 = vset.pattern.permute.xlu1 %v1255_v18  ;;  %1182 = vset.pattern.permute.xlu0 %v1255_v18 }
  0x12   : > { %v1134_v7 = vpack.c.bf16 %v239_v6, %v238_v5  ;;  %376 = vperm.xlu1 %1183, %v241_v11   ;;  %372 = vperm.xlu0 %1182, %v240_v4  }
  0x14   : > { %1135 = vmatprep.subr.bf16.mxu0 %v1134_v7  ;;  %1146 = vmatprep.subr.bf16.mxu1 %v1134_v7 }
  0x15   : > { %1137 = vmatpush3.bf16.msra.mxu0 %v1134_v7  ;;  %1147 = vmatpush3.bf16.msra.mxu1 %v1134_v7 }
  0x16   : > { %1139 = vmatprep.subr.bf16.mxu1 %v1134_v7  ;;  %1143 = vmatprep.subr.bf16.mxu0 %v1134_v7 }
  0x17   : > { %380 = vperm.xlu1 %1183, %v242_v3   ;;  %384 = vperm.xlu0 %1182, %v243_v8  }
  0x18   : > { %1109 = vmatmul.mubr.msk.f32.vlgmr.msra.gmra.mrb[0].mxu0 %vm268_vm0, %v245_v9  ;;  %1112 = vmatmul.mubr.msk.f32.vlgmr.msra.gmra.mrb[0].mxu1 %vm268_vm0, %v247_v10 }
  0x19   : > { %1141 = vmatpush3.bf16.msra.mxu1 %v1134_v7  ;;  %1145 = vmatpush3.bf16.msra.mxu0 %v1134_v7 }
  0x1a   : > { %1118 = vmatprep.mubr.msk.f32.mxu1 %vm268_vm0, %v1038_v12  ;;  %1128 = vmatprep.mubr.msk.f32.mxu0 %vm268_vm0, %v1046_v13 }
  0x1b   : > { %1184 = vset.pattern.permute.xlu1 %v1256_v21  ;;  %1185 = vset.pattern.permute.xlu0 %v1256_v21 }
  0x1c   : > { %1119 = vmatmul.mubr.msk.f32.vlgmr.msra.gmra.mrb[2].mxu1 %vm268_vm0, %v1039_v14  ;;  %1129 = vmatmul.mubr.msk.f32.vlgmr.msra.gmra.mrb[2].mxu0 %vm268_vm0, %v1047_v15 }
  0x1d   : > { %1121 = vmatprep.mubr.msk.f32.mxu1 %vm268_vm0, %v1040_v16  ;;  %1131 = vmatprep.mubr.msk.f32.mxu0 %vm268_vm0, %v1048_v17 }
  0x1e   : > { %490 = vperm.xlu1 %1184, %v240_v4   ;;  %494 = vperm.xlu0 %1185, %v241_v11  }
  0x20   : > { %1122 = vmatmul.mubr.msk.f32.gmra.mrb[4].mxu1 %vm268_vm0, %v1041_v19  ;;  %1132 = vmatmul.mubr.msk.f32.gmra.mrb[4].mxu0 %vm268_vm0, %v1049_v20 }
  0x22   : > { %498 = vperm.xlu1 %1184, %v242_v3   ;;  %1186 = vset.pattern.permute.xlu0 %v1257_v22 }
  0x23   : > { %627 = vperm.xlu0 %1186, %v240_v4  }
  0x26   : > { %502 = vperm.xlu1 %1184, %v243_v8  }
  0x27   : > { %639 = vperm.xlu0 %1186, %v243_v8  }
  0x2a   : > { %1187 = vset.pattern.permute.xlu1 %v1257_v22 }
  0x2b   : > { %631 = vperm.xlu1 %1187, %v241_v11   ;;  %1194 = vset.pattern.permute.xlu0 %v1254_v2 }
  0x2f   : > { %635 = vperm.xlu1 %1187, %v242_v3  }
  0x33   : > { %1188 = vset.pattern.permute.xlu1 %v1254_v2 }
  0x88   : > { %v261_v23 = vpop.permute.xlu1 %260  ;;  %v251_v25 = vpop.permute.xlu0 %250 }
  0x8c   : > { %v266_v24 = vpop.permute.xlu1 %265  ;;  %v256_v27 = vpop.permute.xlu0 %255 }
  0x91   : > { %v377_v26 = vpop.permute.xlu1 %376  ;;  %v373_v29 = vpop.permute.xlu0 %372 }
  0x96   : > { %v381_v28 = vpop.permute.xlu1 %380  ;;  %v385_v31 = vpop.permute.xlu0 %384 }
  0x9d   : > { %v491_v30 = vpop.permute.xlu1 %490  ;;  %v495_v33 = vpop.permute.xlu0 %494 }
  0xa1   : > { %v499_v32 = vpop.permute.xlu1 %498 }
  0xa2   : > { %v628_v35 = vpop.permute.xlu0 %627 }
  0xa5   : > { %v503_v34 = vpop.permute.xlu1 %502 }
  0xa6   : > { %v640_v45 = vpop.permute.xlu0 %639 }
  0xaa   : > { %v632_v36 = vpop.permute.xlu1 %631 }
  0xae   : > { %v636_v46 = vpop.permute.xlu1 %635 }
  0xeb   : > { %v1110_v37 = vpop.f32.mrb[0].mxu0  ;;  %v1113_v38 = vpop.f32.mrb[0].mxu1 }
  0xec   : > { %v353_v39 = vadd.f32 %v1110_v37, %v256_v27  ;;  %v363_v40 = vadd.f32 %v1113_v38, %v266_v24  ;;  %v347_v41 = vpop.f32.mrb[1].mxu0  ;;  %v357_v42 = vpop.f32.mrb[1].mxu1 }
  0xed   : > { %v348_v43 = vadd.f32 %v347_v41, %v251_v25  ;;  %v358_v44 = vadd.f32 %v357_v42, %v261_v23 }
  0xee   : > { %vm603_vm1 = vcmp.ge.f32.partialorder %v353_v39, 0.0  ;;  %vm605_vm2 = vcmp.ge.f32.partialorder %v363_v40, 0.0 }
  0xef   : > { %v1055_v48 = vsel %vm603_vm1, 1.0, %v1258_v47  ;;  %vm602_vm3 = vcmp.ge.f32.partialorder %v348_v43, 0.0  ;;  %vm604_vm4 = vcmp.ge.f32.partialorder %v358_v44, 0.0  ;;  %v1057_v49 = vsel %vm605_vm2, 1.0, %v1258_v47  ;;  %v1120_v50 = vpop.f32.mrb[2].mxu1  ;;  %v1130_v51 = vpop.f32.mrb[2].mxu0 }
  0xf0   : > { %v643_v52 = vmul.f32 %v1055_v48, %v632_v36  ;;  %v1054_v53 = vsel %vm602_vm3, 1.0, %v1258_v47  ;;  %v471_v54 = vadd.f32 %v1120_v50, %v377_v26  ;;  %v465_v55 = vpop.f32.mrb[3].mxu1  ;;  %v583_v56 = vpop.f32.mrb[3].mxu0  ;;  %v589_v58 = vadd.f32 %v1130_v51, %v495_v33 }
  0xf1   : > { %v642_v57 = vmul.f32 %v1054_v53, %v628_v35  ;;  %v1056_v59 = vsel %vm604_vm4, 1.0, %v1258_v47  ;;  %v466_v60 = vadd.f32 %v465_v55, %v373_v29  ;;  %v645_v61 = vmul.f32 %v1057_v49, %v640_v45 }
  0xf2   : > { %vm615_vm5 = vcmp.ge.f32.partialorder %v471_v54, 0.0  ;;  %v584_v62 = vadd.f32 %v583_v56, %v491_v30  ;;  %v647_v0 = vadd.f32 %v643_v52, %v589_v58  ;;  %v644_v1 = vmul.f32 %v1056_v59, %v636_v46 }
  0xf3   : > { %v1059_v63 = vsel %vm615_vm5, 1.0, %v1258_v47  ;;  %vm614_vm6 = vcmp.ge.f32.partialorder %v466_v60, 0.0  ;;  %v1123_v2 = vpop.f32.mrb[4].mxu1  ;;  %v1133_v3 = vpop.f32.mrb[4].mxu0 }
  0xf4   : > { %v663_v4 = vsub.f32 1.0, %v1059_v63  ;;  %v1058_v5 = vsel %vm614_vm6, 1.0, %v1258_v47  ;;  %v646_v6 = vadd.f32 %v642_v57, %v584_v62  ;;  %v481_v7 = vadd.f32 %v1123_v2, %v385_v31  ;;  %v475_v8 = vpop.f32.mrb[5].mxu1  ;;  %v593_v9 = vpop.f32.mrb[5].mxu0 }
  0xf5   : > { %vm651_vm7 = vcmp.ge.f32.partialorder %v647_v0, 0.0  ;;  %v662_v10 = vsub.f32 1.0, %v1058_v5  ;;  %v599_v11 = vadd.f32 %v1133_v3, %v503_v34  ;;  %v476_v12 = vadd.f32 %v475_v8, %v381_v28 }
  0xf6   : > { %v1063_v13 = vsel %vm651_vm7, 1.0, %v1258_v47  ;;  %vm650_vm8 = vcmp.ge.f32.partialorder %v646_v6, 0.0  ;;  %vm617_vm9 = vcmp.ge.f32.partialorder %v481_v7, 0.0  ;;  %v594_v14 = vadd.f32 %v593_v9, %v499_v32 }
  0xf7   : > { %v667_v15 = vmul.f32 %v1063_v13, %v663_v4  ;;  %v1062_v16 = vsel %vm650_vm8, 1.0, %v1258_v47  ;;  %v1061_v17 = vsel %vm617_vm9, 1.0, %v1258_v47  ;;  %v649_v18 = vadd.f32 %v645_v61, %v599_v11 }
  0xf8   : > { %v666_v19 = vmul.f32 %v1062_v16, %v662_v10  ;;  %v665_v20 = vsub.f32 1.0, %v1061_v17  ;;  %vm616_vm10 = vcmp.ge.f32.partialorder %v476_v12, 0.0  ;;  %v648_v21 = vadd.f32 %v644_v1, %v594_v14 }
  0xf9   : > { %vm653_vm11 = vcmp.ge.f32.partialorder %v649_v18, 0.0  ;;  %v1060_v22 = vsel %vm616_vm10, 1.0, %v1258_v47  ;;  %730 = vrot.lane.b32.xlu0 %v667_v15, %s1259_s29  ;;  %vm685_vm0 = vcmp.gt.f32.partialorder %v667_v15, 1.0  ;;  %v721_v34 = vmul.f32 0.99, %v667_v15 }
  0xfa   : > { %v1065_v23 = vsel %vm653_vm11, 1.0, %v1258_v47  ;;  %v664_v24 = vsub.f32 1.0, %v1060_v22  ;;  %vm652_vm12 = vcmp.ge.f32.partialorder %v648_v21, 0.0  ;;  %728 = vrot.lane.b32.xlu1 %v666_v19, %s1259_s29  ;;  %vm684_vm15 = vcmp.gt.f32.partialorder %v666_v19, 1.0 }
  0xfb   : > { %v669_v25 = vmul.f32 %v1065_v23, %v665_v20  ;;  %v1064_v26 = vsel %vm652_vm12, 1.0, %v1258_v47  ;;  %v1066_v30 = vsel %vm684_vm15, 1.0, %v1258_v47  ;;  %v1067_v31 = vsel %vm685_vm0, 1.0, %v1258_v47 }
  0xfc   : > { %v668_v27 = vmul.f32 %v1064_v26, %v664_v24  ;;  %v1189_v33 = vpack.i.bf16 %v1067_v31, %v1066_v30  ;;  %v720_v36 = vmul.f32 0.99, %v666_v19 }
  0xfd   : > { %791 = vrot.lane.b32.xlu0 %v667_v15, %s1260_s30  ;;  %vm687_vm14 = vcmp.gt.f32.partialorder %v669_v25, 1.0  ;;  %v723_v50 = vmul.f32 0.99, %v669_v25 }
  0xfe   : > { %789 = vrot.lane.b32.xlu1 %v666_v19, %s1260_s30  ;;  %vm686_vm13 = vcmp.gt.f32.partialorder %v668_v27, 1.0  ;;  %v1069_v29 = vsel %vm687_vm14, 1.0, %v1258_v47  ;;  %v722_v53 = vmul.f32 0.99, %v668_v27 }
  0xff   : > { %v1068_v28 = vsel %vm686_vm13, 1.0, %v1258_v47 }
 0x100   : > { %v1195_v32 = vpack.i.bf16 %v1069_v29, %v1068_v28 }
 0x101   : > { %734 = vrot.lane.b32.xlu0 %v669_v25, %s1259_s29 }
 0x102   : > { %732 = vrot.lane.b32.xlu1 %v668_v27, %s1259_s29 }
 0x105   : > { %795 = vrot.lane.b32.xlu0 %v669_v25, %s1260_s30 }
 0x106   : > { %793 = vrot.lane.b32.xlu1 %v668_v27, %s1260_s30 }
 0x109   : > { %852 = vrot.lane.b32.xlu0 %v667_v15, %s1261_s4 }
 0x10a   : > { %850 = vrot.lane.b32.xlu1 %v666_v19, %s1261_s4 }
 0x10d   : > { %856 = vrot.lane.b32.xlu0 %v669_v25, %s1261_s4 }
 0x10e   : > { %854 = vrot.lane.b32.xlu1 %v668_v27, %s1261_s4 }
 0x111   : > { %1196 = vperm.xlu0 %1194, %v1195_v32  }
 0x112   : > { %1190 = vperm.xlu1 %1188, %v1189_v33  }
 0x16b   : > { %v731_v35 = vpop.permute.xlu0 %730 }
 0x16c   : > { %v741_v37 = vadd.f32 %v731_v35, %v721_v34  ;;  %v729_v38 = vpop.permute.xlu1 %728 }
 0x16d   : > { %v740_v39 = vadd.f32 %v729_v38, %v720_v36  ;;  %v670_v38 = vlaneseq }
 0x16e   : > { %v745_v40 = vsub.f32 %v741_v37, %v1067_v31 }
 0x16f   : > { %v744_v41 = vsub.f32 %v740_v39, %v1066_v30  ;;  %v792_v42 = vpop.permute.xlu0 %791 }
 0x170   : > { %vm750_vm1 = vcmp.gt.f32.partialorder %v745_v40, 1.0  ;;  %v786_v43 = vmul.f32 0.99, %v745_v40  ;;  %v790_v44 = vpop.permute.xlu1 %789 }
 0x171   : > { %v1071_v45 = vsel %vm750_vm1, 1.0, %v1258_v47  ;;  %vm749_vm2 = vcmp.gt.f32.partialorder %v744_v41, 1.0  ;;  %v785_v46 = vmul.f32 0.99, %v744_v41  ;;  %v671_v41 = vand.u32 127, %v670_v38 }
 0x172   : > { %v802_v48 = vadd.f32 %v792_v42, %v786_v43  ;;  %v1070_v49 = vsel %vm749_vm2, 1.0, %v1258_v47  ;;  %vm907_vm1 = vcmask 31744  }
 0x173   : > { %v801_v51 = vadd.f32 %v790_v44, %v785_v46  ;;  %v735_v52 = vpop.permute.xlu0 %734  ;;  %v1200_v54 = vpack.i.bf16 %v1071_v45, %v1070_v49  ;;  %vm683_vm13 = vcmp.eq.s32.totalorder %v671_v41, 0  ;;  %vm748_vm14 = vcmp.eq.s32.totalorder %v671_v41, 1 }
 0x174   : > { %v806_v55 = vsub.f32 %v802_v48, %v1071_v45  ;;  %v743_v56 = vadd.f32 %v735_v52, %v723_v50  ;;  %v733_v57 = vpop.permute.xlu1 %732  ;;  %vm809_vm15 = vcmp.eq.s32.totalorder %v671_v41, 2  ;;  %vm870_vm0 = vcmp.eq.s32.totalorder %v671_v41, 3 }
 0x175   : > { %v805_v58 = vsub.f32 %v801_v51, %v1070_v49  ;;  %v742_v59 = vadd.f32 %v733_v57, %v722_v53  ;;  %1201 = vperm.xlu1 %1188, %v1200_v54  }
 0x176   : > { %v747_v60 = vsub.f32 %v743_v56, %v1069_v29  ;;  %vm811_vm3 = vcmp.gt.f32.partialorder %v806_v55, 1.0  ;;  %v847_v8 = vmul.f32 0.99, %v806_v55 }
 0x177   : > { %vm810_vm4 = vcmp.gt.f32.partialorder %v805_v58, 1.0  ;;  %v746_v61 = vsub.f32 %v742_v59, %v1068_v28  ;;  %v796_v62 = vpop.permute.xlu0 %795  ;;  %v1075_v63 = vsel %vm811_vm3, 1.0, %v1258_v47  ;;  %v846_v11 = vmul.f32 0.99, %v805_v58 }
 0x178   : > { %vm752_vm5 = vcmp.gt.f32.partialorder %v747_v60, 1.0  ;;  %v788_v0 = vmul.f32 0.99, %v747_v60  ;;  %v794_v1 = vpop.permute.xlu1 %793  ;;  %v1074_v2 = vsel %vm810_vm4, 1.0, %v1258_v47 }
 0x179   : > { %v1073_v3 = vsel %vm752_vm5, 1.0, %v1258_v47  ;;  %vm751_vm6 = vcmp.gt.f32.partialorder %v746_v61, 1.0  ;;  %v787_v4 = vmul.f32 0.99, %v746_v61  ;;  %v1210_v5 = vpack.i.bf16 %v1075_v63, %v1074_v2 }
 0x17a   : > { %v804_v6 = vadd.f32 %v796_v62, %v788_v0  ;;  %v1072_v7 = vsel %vm751_vm6, 1.0, %v1258_v47 }
 0x17b   : > { %v803_v9 = vadd.f32 %v794_v1, %v787_v4  ;;  %v853_v10 = vpop.permute.xlu0 %852  ;;  %1211 = vperm.xlu0 %1194, %v1210_v5   ;;  %v1205_v12 = vpack.i.bf16 %v1073_v3, %v1072_v7 }
 0x17c   : > { %v808_v13 = vsub.f32 %v804_v6, %v1073_v3  ;;  %v863_v14 = vadd.f32 %v853_v10, %v847_v8  ;;  %v851_v15 = vpop.permute.xlu1 %850 }
 0x17d   : > { %v807_v16 = vsub.f32 %v803_v9, %v1072_v7  ;;  %v862_v17 = vadd.f32 %v851_v15, %v846_v11  ;;  %1206 = vperm.xlu1 %1188, %v1205_v12  }
 0x17e   : > { %v867_v18 = vsub.f32 %v863_v14, %v1075_v63  ;;  %vm813_vm7 = vcmp.gt.f32.partialorder %v808_v13, 1.0  ;;  %v849_v19 = vmul.f32 0.99, %v808_v13 }
 0x17f   : > { %v866_v20 = vsub.f32 %v862_v17, %v1074_v2  ;;  %v857_v21 = vpop.permute.xlu0 %856  ;;  %v1077_v22 = vsel %vm813_vm7, 1.0, %v1258_v47  ;;  %vm812_vm8 = vcmp.gt.f32.partialorder %v807_v16, 1.0  ;;  %v848_v23 = vmul.f32 0.99, %v807_v16 }
 0x180   : > { %vm872_vm9 = vcmp.gt.f32.partialorder %v867_v18, 1.0  ;;  %v865_v24 = vadd.f32 %v857_v21, %v849_v19  ;;  %v1076_v25 = vsel %vm812_vm8, 1.0, %v1258_v47  ;;  %v855_v26 = vpop.permute.xlu1 %854 }
 0x181   : > { %v1079_v27 = vsel %vm872_vm9, 1.0, %v1258_v47  ;;  %vm871_vm10 = vcmp.gt.f32.partialorder %v866_v20, 1.0  ;;  %v864_v28 = vadd.f32 %v855_v26, %v848_v23  ;;  %v1215_v29 = vpack.i.bf16 %v1077_v22, %v1076_v25 }
 0x182   : > { %v1078_v30 = vsel %vm871_vm10, 1.0, %v1258_v47  ;;  %v869_v31 = vsub.f32 %v865_v24, %v1077_v22 }
 0x183   : > { %v868_v32 = vsub.f32 %v864_v28, %v1076_v25  ;;  %1216 = vperm.xlu1 %1188, %v1215_v29   ;;  %v1220_v33 = vpack.i.bf16 %v1079_v27, %v1078_v30 }
 0x184   : > { %vm874_vm11 = vcmp.gt.f32.partialorder %v869_v31, 1.0 }
 0x185   : > { %v1081_v34 = vsel %vm874_vm11, 1.0, %v1258_v47  ;;  %vm873_vm12 = vcmp.gt.f32.partialorder %v868_v32, 1.0  ;;  %1221 = vperm.xlu0 %1194, %v1220_v33  }
 0x186   : > { %v1080_v35 = vsel %vm873_vm12, 1.0, %v1258_v47 }
 0x187   : > { %v1225_v36 = vpack.i.bf16 %v1081_v34, %v1080_v35 }
 0x189   : > { %1226 = vperm.xlu1 %1188, %v1225_v36  }
 0x190   : > { %v1197_v39 = vpop.permute.xlu0 %1196 }
 0x191   : > { %v1191_v37 = vpop.permute.xlu1 %1190  ;;  %v1199_v53 = vunpack.i.h.bf16 %v1197_v39  ;;  %v1198_v54 = vunpack.i.l.bf16 %v1197_v39 }
 0x192   : > { %v1193_v42 = vunpack.i.h.bf16 %v1191_v37  ;;  %v1192_v43 = vunpack.i.l.bf16 %v1191_v37 }
 0x193   : > { %v719_v4 = vsel %vm683_vm13, %v1199_v53, 0.0  ;;  %v718_v5 = vsel %vm683_vm13, %v1198_v54, 0.0 }
 0x194   : > { %v717_v47 = vsel %vm683_vm13, %v1193_v42, 0.0  ;;  %v716_v51 = vsel %vm683_vm13, %v1192_v43, 0.0 }
 0x1f4   : > { %v1202_v40 = vpop.permute.xlu1 %1201 }
 0x1f5   : > { %v1204_v46 = vunpack.i.h.bf16 %v1202_v40  ;;  %v1203_v48 = vunpack.i.l.bf16 %v1202_v40 }
 0x1f7   : > { %v782_v55 = vsel %vm748_vm14, %v1204_v46, %v717_v47  ;;  %v781_v56 = vsel %vm748_vm14, %v1203_v48, %v716_v51 }
 0x1fa   : > { %v1212_v44 = vpop.permute.xlu0 %1211 }
 0x1fb   : > { %v1214_v49 = vunpack.i.h.bf16 %v1212_v44  ;;  %v1213_v50 = vunpack.i.l.bf16 %v1212_v44 }
 0x1fc   : > { %v1207_v45 = vpop.permute.xlu1 %1206 }
 0x1fd   : > { %v1209_v58 = vunpack.i.h.bf16 %v1207_v45  ;;  %v1208_v59 = vunpack.i.l.bf16 %v1207_v45  ;;  %v843_v62 = vsel %vm809_vm15, %v1214_v49, %v782_v55  ;;  %v842_v63 = vsel %vm809_vm15, %v1213_v50, %v781_v56 }
 0x1ff   : > { %v784_v7 = vsel %vm748_vm14, %v1209_v58, %v719_v4  ;;  %v783_v8 = vsel %vm748_vm14, %v1208_v59, %v718_v5 }
 0x202   : > { %v1217_v52 = vpop.permute.xlu1 %1216 }
 0x203   : > { %v1219_v0 = vunpack.i.h.bf16 %v1217_v52  ;;  %v1218_v1 = vunpack.i.l.bf16 %v1217_v52 }
 0x204   : > { %v1222_v57 = vpop.permute.xlu0 %1221 }
 0x205   : > { %v1224_v60 = vunpack.i.h.bf16 %v1222_v57  ;;  %v1223_v61 = vunpack.i.l.bf16 %v1222_v57  ;;  %v844_v11 = vsel %vm809_vm15, %v1218_v1, %v783_v8  ;;  %v845_v12 = vsel %vm809_vm15, %v1219_v0, %v784_v7 }
 0x207   : > { %v904_v2 = vsel %vm870_vm0, %v1224_v60, %v843_v62  ;;  %v903_v3 = vsel %vm870_vm0, %v1223_v61, %v842_v63 }
 0x208   : > { %909 = vst.msk [vmem:[%s236_s12 + $0x8] sm:$0xff] %vm907_vm1, %v904_v2  ;;  %908 = vst.msk [vmem:[%s236_s12] sm:$0xff] %vm907_vm1, %v903_v3  ;;  %v1227_v6 = vpop.permute.xlu1 %1226 }
 0x209   : > { %v1229_v9 = vunpack.i.h.bf16 %v1227_v6  ;;  %v1228_v10 = vunpack.i.l.bf16 %v1227_v6 }
 0x20b   : > { %v905_v13 = vsel %vm870_vm0, %v1228_v10, %v844_v11  ;;  %v906_v14 = vsel %vm870_vm0, %v1229_v9, %v845_v12 }
 0x20c   : > { %910 = vst.msk [vmem:[%s236_s12 + $0x10] sm:$0xff] %vm907_vm1, %v905_v13  ;;  %911 = vst.msk [vmem:[%s236_s12 + $0x18] sm:$0xff] %vm907_vm1, %v906_v14 }
 0x20d PF: > { %s13_s14 = sadd.s32 1, %s1252_s14   ;;  %s1435_s12 = smov %s1248_s13 }
 0x20e   : > { %p10_p5 = scmp.ge.s32.totalorder %s13_s14, 4   ;;  %s1436_s13 = smov %s1438_s15 }
 0x210   :  { %12 = sbr.rel (!%p10_p5) target bundleno = 2 (0x2), region = 70 }

</bundles_post_ra>
